<compile_context>
chip_gen: v7x
topology: tpu7x:2x2x1
jax: 0.10.0
libtpu: 0.0.40
codegen_flags: <defaults>
</compile_context>

<pallas_src>
import functools

import jax
import jax.numpy as jnp
from jax.experimental import pallas as pl
from jax.experimental.pallas import tpu as pltpu


_VMEM_LIMIT_BYTES = 32 * 1024 * 1024    # v5e scoped default is 16 MiB -> raise explicitly.
_TARGET_BLOCK_BYTES = 4 * 1024 * 1024   # per-array block; x2 arrays x2 buffers = 16 MiB.
_FLAT_BLOCK_ELEMS = 128 * 1024          # ragged 1-D fallback block (multiple of 8*128).


def _hardshrink_kernel(x_ref, o_ref, *, lam, alpha):
    # Thresholds are compared in x.dtype (matches the module, where python
    # floats broadcast against x). Assumes 0 <= lam <= alpha (module defaults).
    x = x_ref[...]
    lam_c = jnp.asarray(lam, x.dtype)
    alpha_c = jnp.asarray(alpha, x.dtype)
    a = jnp.abs(x)
    # keep is False for |x| <= lam, |x| == alpha, and NaN -> all map to 0,
    # exactly like the original "all masks false" behaviour.
    keep = (a > lam_c) & (a != alpha_c)
    clipped = jnp.minimum(jnp.maximum(x, -alpha_c), alpha_c)
    o_ref[...] = jnp.where(keep, clipped, jnp.zeros_like(x))


def _run(x_view, block_shape, lam, alpha, donate):
    """Run the elementwise kernel over a 1-D or 2-D lane-dense view of x."""
    if x_view.ndim == 2:
        index_map = lambda i: (i, 0)
    else:
        index_map = lambda i: (i,)
    grid = (pl.cdiv(x_view.shape[0], block_shape[0]),)

    n = x_view.size
    itemsize = jnp.dtype(x_view.dtype).itemsize
    kernel = functools.partial(_hardshrink_kernel, lam=float(lam), alpha=float(alpha))
    return pl.pallas_call(
        kernel,
        out_shape=jax.ShapeDtypeStruct(x_view.shape, x_view.dtype),
        grid=grid,
        in_specs=[pl.BlockSpec(block_shape, index_map)],
        out_specs=pl.BlockSpec(block_shape, index_map),
        # Only alias when the caller genuinely donates x; otherwise XLA would
        # insert a defensive full copy (extra HBM read+write).
        input_output_aliases=({0: 0} if donate else {}),
        compiler_params=pltpu.CompilerParams(
            # Blocks are independent -> shard across v7x's 2 TensorCores;
            # neutral on single-TC v5e/v6e.
            dimension_semantics=("parallel",),
            vmem_limit_bytes=_VMEM_LIMIT_BYTES,
        ),
        cost_estimate=pl.CostEstimate(
            flops=7 * n, transcendentals=0, bytes_accessed=2 * n * itemsize),
    )(x_view)


def _choose_lanes(n):
    """Widest lane count that divides n exactly (common for conv feature maps)."""
    for lanes in (1024, 512, 256, 128):
        if n % lanes == 0:
            return lanes
    return None


def hardshrink_mod(x, lam=0.5, alpha=1.0, *, donate=False):
    """Elementwise HardShrink-with-clamp; works for any shape (e.g. NCHW).

    Set donate=True only when the caller donates x (its buffer may be reused
    for the output; do not read x afterwards).
    """
    orig_shape = x.shape
    n = x.size
    itemsize = jnp.dtype(x.dtype).itemsize
    sublane = max(8, 32 // itemsize)   # 8 f32 / 16 bf16 / 32 int8 rows per vreg

    lanes = _choose_lanes(n)
    if lanes is not None:
        # Common case: lane-dense 2-D slab (free reshape, unmasked vld/vst).
        rows = n // lanes
        x2d = x.reshape(rows, lanes)
        block_rows = max(
            sublane, (_TARGET_BLOCK_BYTES // (lanes * itemsize)) // sublane * sublane)
        if rows > sublane:
            # v7x megacore: guarantee >= 2 blocks so both TCs get work.
            half = pl.cdiv(pl.cdiv(rows, 2), sublane) * sublane
            block_rows = min(block_rows, half)
        block_rows = min(block_rows, rows)
        out2d = _run(x2d, (block_rows, lanes), lam, alpha, donate)
        return out2d.reshape(orig_shape)

    # Ragged fallback: flat 1-D blocks; Pallas masks the partial last block,
    # so there is no jnp.pad / slice round trip (no extra HBM passes).
    # TODO(synk): sweep pipeline_mode=pl.Buffered(3) if profiles show exposed
    # input-DMA latency on v7x at these block sizes.
    x_flat = x.reshape(-1)
    block_elems = _FLAT_BLOCK_ELEMS if n > _FLAT_BLOCK_ELEMS else n
    out_flat = _run(x_flat, (block_elems,), lam, alpha, donate)
    return out_flat.reshape(orig_shape)


def _reference(x, lam=0.5, alpha=1.0):
    # Literal translation of the PyTorch forward (same mask order).
    y = jnp.zeros_like(x)
    y = jnp.where(x > alpha, alpha, y)
    y = jnp.where((lam < x) & (x < alpha), x, y)
    y = jnp.where((-alpha < x) & (x < -lam), x, y)
    y = jnp.where(x < -alpha, -alpha, y)
    return y


if __name__ == "__main__":
    key = jax.random.PRNGKey(0)

    # NCHW feature map consistent with the conv-net context.
    x = jax.random.normal(key, (2, 4, 16, 16), dtype=jnp.float32) * 2.0
    # Pin exact boundary values (must all map to 0), plus a NaN (-> 0 in torch).
    x = x.at[0, 0, 0, 0].set(1.0)      # == alpha
    x = x.at[0, 0, 0, 1].set(-1.0)     # == -alpha
    x = x.at[0, 0, 0, 2].set(0.5)      # == lam
    x = x.at[0, 0, 0, 3].set(-0.5)     # == -lam
    x = x.at[0, 0, 0, 4].set(jnp.nan)  # NaN -> 0

    ref = _reference(x, 0.5, 1.0)
    out = jax.block_until_ready(hardshrink_mod(x, 0.5, 1.0))
    assert out.shape == x.shape and out.dtype == x.dtype
    assert jnp.array_equal(out, ref), "mismatch vs reference (2-D path)"

    # Donating call site (output may reuse x's buffer); ref computed above.
    out_d = jax.block_until_ready(hardshrink_mod(x, 0.5, 1.0, donate=True))
    assert jnp.array_equal(out_d, ref), "mismatch vs reference (donate path)"

    # Larger divisible size -> multi-block grid (exercises the parallel split).
    x1 = jax.random.normal(jax.random.PRNGKey(2), (4, 8, 32, 32),
                           dtype=jnp.float32) * 2.0
    ref1 = _reference(x1, 0.5, 1.0)
    out1 = jax.block_until_ready(hardshrink_mod(x1, 0.5, 1.0))
    assert out1.shape == x1.shape and jnp.array_equal(out1, ref1), \
        "mismatch vs reference (multi-block path)"

    # Ragged size exercises the flat 1-D fallback (no pad round trip).
    x2 = jax.random.normal(jax.random.PRNGKey(1), (2, 3, 7, 5),
                           dtype=jnp.float32) * 2.0
    ref2 = _reference(x2, 0.5, 1.0)
    out2 = jax.block_until_ready(hardshrink_mod(x2, 0.5, 1.0))
    assert out2.shape == x2.shape and jnp.array_equal(out2, ref2), \
        "mismatch vs reference (ragged 1-D path)"

    print("KERNEL_OK")
</pallas_src>

<mosaic_0001>
module attributes {stable_mosaic.version = 11 : i64} {
  func.func @_hardshrink_kernel(%arg0: i32, %arg1: memref<2x1024xf32, #tpu.memory_space<vmem>>, %arg2: memref<2x1024xf32, #tpu.memory_space<vmem>>) attributes {dimension_semantics = [#tpu.dimension_semantics<parallel>], iteration_bounds = array<i64: 1>, scalar_prefetch = 0 : i64, scratch_operands = 0 : i64, tpu.core_type = #tpu.core_type<tc>, window_params = [{transform_indices = @transform_0, window_bounds = array<i64: 2, 1024>}, {transform_indices = @transform_1, window_bounds = array<i64: 2, 1024>}]} {
    %c0 = arith.constant 0 : index
    %c0_0 = arith.constant 0 : index
    %0 = vector.load %arg1[%c0, %c0_0] : memref<2x1024xf32, #tpu.memory_space<vmem>>, vector<2x1024xf32>
    %1 = math.absf %0 : vector<2x1024xf32>
    %cst = arith.constant 5.000000e-01 : f32
    %2 = vector.broadcast %cst : f32 to vector<2x1024xf32>
    %3 = arith.cmpf ogt, %1, %2 : vector<2x1024xf32>
    %cst_1 = arith.constant 1.000000e+00 : f32
    %4 = vector.broadcast %cst_1 : f32 to vector<2x1024xf32>
    %5 = arith.cmpf one, %1, %4 : vector<2x1024xf32>
    %6 = arith.andi %3, %5 : vector<2x1024xi1>
    %cst_2 = arith.constant 0.000000e+00 : f32
    %cst_3 = arith.constant 1.000000e+00 : f32
    %7 = arith.subf %cst_2, %cst_3 : f32
    %8 = vector.broadcast %7 : f32 to vector<2x1024xf32>
    %9 = arith.maximumf %0, %8 : vector<2x1024xf32>
    %cst_4 = arith.constant 1.000000e+00 : f32
    %10 = vector.broadcast %cst_4 : f32 to vector<2x1024xf32>
    %11 = arith.minimumf %9, %10 : vector<2x1024xf32>
    %cst_5 = arith.constant 0.000000e+00 : f32
    %12 = vector.broadcast %cst_5 : f32 to vector<2x1024xf32>
    %13 = arith.select %6, %11, %12 : vector<2x1024xi1>, vector<2x1024xf32>
    %c0_6 = arith.constant 0 : index
    %c0_7 = arith.constant 0 : index
    %14 = vector.load %arg2[%c0_6, %c0_7] : memref<2x1024xf32, #tpu.memory_space<vmem>>, vector<2x1024xf32>
    tpu.vector_store %arg2[%c0_6, %c0_7], %13 {strides = array<i32>} : memref<2x1024xf32, #tpu.memory_space<vmem>>, vector<2x1024xf32>,
    return
  }
  func.func @transform_0(%arg0: i32) -> (i32, i32) {
    %c0_i32 = arith.constant 0 : i32
    %c0_i32_0 = arith.constant 0 : i32
    return %arg0, %c0_i32 : i32, i32
  }
  func.func @transform_1(%arg0: i32) -> (i32, i32) {
    %c0_i32 = arith.constant 0 : i32
    %c0_i32_0 = arith.constant 0 : i32
    return %arg0, %c0_i32 : i32, i32
  }
}

</mosaic_0001>

<bundles_post_ra>
// kernel: tpu_custom_call.1
= control target key start
LH: loop header
LB: loop body
LE: loop exit
PB: predicated region body
PF: predicated region fallthrough
CT: control target
= control target key end

     0   :  { %6 = vsyncpa [#allocation3], 0  ;;  %s142_s0 = inlined_call_operand.hbm [shape: f32[2,1024], index: 0, kind: input, shape index: {}]   ;;  %s143_s1 = inlined_call_operand.hbm [shape: f32[2,1024], index: 1, kind: output, shape index: {}]  }
   0x1   :  { %7 = vsyncpa [#allocation4], 0  ;;  %s106_s6 = smov [#allocation2]   ;;  %s58_s10 = scalar_lea.hbm %s142_s0, 256 }
   0x2   :  { %s14_s7 = sshll.u32 %s106_s6, 4  ;;  %p59_p0 = scmp.ne.s32.totalorder %s142_s0, %s58_s10  ;;  %s15_s7 = int_to_ptr.vmem [resolvable:$true] %s14_s7 }
   0x3   :  { %p62_p1 = scmp.lt.u32.totalorder %s58_s10, %s142_s0 }
   0x5   :  { %p64_p2 = pnand %p62_p1, %p59_p0 }
   0x7   :  { %67 = shalt.err (!%p64_p2)
}
   0x8   :  { %s68_s15 = scalar_lea.vmem %s15_s7, 256  ;;  %p73_p4 = scmp.lt.s32.totalorder %s15_s7, %s15_s7 }
   0x9   :  { %p69_p3 = scmp.ne.s32.totalorder %s15_s7, %s68_s15  ;;  %p74_p5 = scmp.lt.s32.totalorder %s68_s15, %s68_s15 }
   0xb   :  { %p75_p6 = por %p74_p5, %p73_p4 }
   0xd   :  { %p76_p7 = pnand %p75_p6, %p69_p3 }
   0xf   :  { %79 = shalt.err (!%p76_p7)
}
  0x10   :  { %17 = dma.hbm_to_vmem [thread:$0]  %s142_s0, 256, %s15_s7, [#allocation3]  }
  0x11   :  { %102 = dma.done.wait [#allocation3], 256  }
  0x12   :  { %103 = vsyncadd [#allocation3], 4294967040  ;;  %v21_v0 = vld [vmem:[#allocation2] sm:$0xff]  ;;  %v22_v1 = vld [vmem:[#allocation2 + $0x8] sm:$0xff]  ;;  %s107_s18 = smov [#allocation5]  }
  0x13   :  { %v23_v2 = vand.u32 2147483647, %v21_v0  ;;  %v54_v3 = vclamps-f32 %v21_v0, 1.0  ;;  %v24_v4 = vand.u32 2147483647, %v22_v1  ;;  %v55_v5 = vclamps-f32 %v22_v1, 1.0 }
  0x14   :  { %s45_s19 = sshll.u32 %s107_s18, 4  ;;  %s46_s19 = int_to_ptr.vmem [resolvable:$true] %s45_s19 }
  0x15   :  { %vm25_vm0 = vcmp.gt.f32.partialorder %v23_v2, 0.5  ;;  %vm27_vm1 = vcmp.ne.f32.partialorder %v23_v2, 1.0  ;;  %vm26_vm2 = vcmp.gt.f32.partialorder %v24_v4, 0.5  ;;  %vm28_vm3 = vcmp.ne.f32.partialorder %v24_v4, 1.0  ;;  %s80_s0 = scalar_lea.vmem %s46_s19, 256  ;;  %p85_p9 = scmp.lt.s32.totalorder %s46_s19, %s46_s19 }
  0x16   :  { %vm29_vm4 = vmand %vm25_vm0, %vm27_vm1  ;;  %p81_p8 = scmp.ne.s32.totalorder %s46_s19, %s80_s0  ;;  %p86_p10 = scmp.lt.s32.totalorder %s80_s0, %s80_s0 }
  0x17   :  { %v35_v6 = vsel %vm29_vm4, %v54_v3, 0.0  ;;  %vm30_vm5 = vmand %vm26_vm2, %vm28_vm3 }
  0x18   :  { %37 = vst [vmem:[#allocation5] sm:$0xff] %v35_v6  ;;  %v36_v7 = vsel %vm30_vm5, %v55_v5, 0.0  ;;  %p87_p11 = por %p86_p10, %p85_p9 }
  0x19   :  { %38 = vst [vmem:[#allocation5 + $0x8] sm:$0xff] %v36_v7 }
  0x1a   :  { %p88_p12 = pnand %p87_p11, %p81_p8 }
  0x1c   :  { %91 = shalt.err (!%p88_p12)
}
  0x1d   :  { %s92_s22 = scalar_lea.hbm %s143_s1, 256 }
  0x1e   :  { %p93_p13 = scmp.ne.s32.totalorder %s143_s1, %s92_s22  ;;  %p96_p0 = scmp.lt.u32.totalorder %s92_s22, %s143_s1 }
  0x20   :  { %p98_p1 = pnand %p96_p0, %p93_p13 }
  0x22   :  { %101 = shalt.err (!%p98_p1)
}
  0x23   :  { %48 = dma.vmem_to_hbm [thread:$0]  %s46_s19, 256, %s143_s1, [#allocation4]  }
  0x24   :  { %104 = dma.done.wait [#allocation4], 256  }
  0x25   :  { %105 = vsyncadd [#allocation4], 4294967040 }
  0x26   :  { %52 = vsyncpa [#allocation3], 1 }
  0x27   :  { %53 = vsyncpa [#allocation4], 1 }

</bundles_post_ra>
